<compile_context>
chip_gen: v7x
topology: tpu7x:2x2x1
jax: 0.10.0
libtpu: 0.0.40
codegen_flags: <defaults>
</compile_context>

<pallas_src>
import functools
import math

import jax
import jax.numpy as jnp
from jax.experimental import pallas as pl
from jax.experimental.pallas import tpu as pltpu


# ----------------------------------------------------------------------------
# Pallas kernel 1: tiled Linear  (y = x @ W + b), W stored as (in, out)
# ----------------------------------------------------------------------------
def _linear_kernel(x_ref, w_ref, b_ref, o_ref):
    acc = jnp.dot(x_ref[...], w_ref[...], preferred_element_type=jnp.float32)
    o_ref[...] = (acc + b_ref[...]).astype(o_ref.dtype)


def pallas_linear(x, w, b, tile_m=1024, out_dtype=None):
    """x: (M, K) f32, w: (K, N) f32, b: (N,) f32 -> (M, N) in out_dtype (default x.dtype)."""
    M, K = x.shape
    N = w.shape[1]
    out_dtype = out_dtype or x.dtype
    if M <= tile_m:
        tm, Mp = M, M                      # single full-extent tile, no pad / slice
    else:
        tm = next((t for t in (tile_m, 512, 256, 128, 64, 32, 16, 8) if M % t == 0), None)
        if tm is None:
            tm = tile_m
            Mp = ((M + tm - 1) // tm) * tm
        else:
            Mp = M
    xp = x if Mp == M else jnp.pad(x, ((0, Mp - M), (0, 0)))
    out = pl.pallas_call(
        _linear_kernel,
        out_shape=jax.ShapeDtypeStruct((Mp, N), out_dtype),
        grid=(Mp // tm,),
        in_specs=[
            pl.BlockSpec((tm, K), lambda i: (i, 0)),
            pl.BlockSpec((K, N), lambda i: (0, 0)),
            pl.BlockSpec((1, N), lambda i: (0, 0)),
        ],
        out_specs=pl.BlockSpec((tm, N), lambda i: (i, 0)),
        compiler_params=pltpu.CompilerParams(dimension_semantics=("parallel",)),
    )(xp, w, b.reshape(1, N))
    return out if Mp == M else out[:M]


# ----------------------------------------------------------------------------
# Pallas kernel 2: deformable bilinear sampling + per-head softmax + reduction
#   (single feature level; matches grid_sample(mode='bilinear',
#    padding_mode='zeros', align_corners=False))
# ----------------------------------------------------------------------------
def _deform_sample_kernel(v_ref, qa_ref, ref_ref, o_ref, *, H, W, nH, P, D, C):
    """Per grid step (camera b, query tile q):
    v_ref  : (1, NV, E)         bf16 value tile, VMEM-resident across query tiles
    qa_ref : (1, TQ, >=3*nH*P)  f32 fused query projection:
             columns [x-offsets (nH*P) | y-offsets (nH*P) | attn logits (nH*P) | zero pad]
             (offsets are already in pixels; they add directly to the pixel-space ref points)
    ref_ref: (1, TQ, 2*D)       f32 pixel-space reference points [x (D) | y (D)]
    o_ref  : (1, TQ, E)         f32 output, channels head-major (h*hd + d)
    """
    NV, E = v_ref.shape[1], v_ref.shape[2]
    hd = E // nH
    nHP = nH * P
    qa = qa_ref[0]                                         # (TQ, Npad)
    rp = ref_ref[0]                                        # (TQ, 2*D)
    TQ = qa.shape[0]

    # ---- per-head softmax over P points: ONE full-width exp, narrow max/sum only ----
    awl = qa[:, 2 * nHP:3 * nHP]                                           # (TQ, nHP)
    m_full = jnp.concatenate(
        [jnp.broadcast_to(jnp.max(awl[:, h * P:(h + 1) * P], axis=-1, keepdims=True), (TQ, P))
         for h in range(nH)], axis=-1)
    e = jnp.exp(awl - m_full)                                              # single EUP pass
    s_full = jnp.concatenate(
        [jnp.broadcast_to(jnp.sum(e[:, h * P:(h + 1) * P], axis=-1, keepdims=True), (TQ, P))
         for h in range(nH)], axis=-1)
    aw = e * pl.reciprocal(s_full, approx=True)                            # (TQ, nHP)

    # ---- pixel-space sampling coordinates, full lane width (no stride-2 slices) ----
    reps = nHP // D
    rpx = jnp.concatenate([rp[:, 0:D]] * reps, axis=-1)                    # (TQ, nHP)
    rpy = jnp.concatenate([rp[:, D:2 * D]] * reps, axis=-1)
    X = rpx + qa[:, 0:nHP]                                                 # sample x (pixels)
    Y = rpy + qa[:, nHP:2 * nHP]                                           # sample y (pixels)

    # flattened feature-map (x, y) of every value row — computed once, float-only math
    colf = jax.lax.broadcasted_iota(jnp.int32, (1, NV), 1).astype(jnp.float32)
    coly = jnp.floor((colf + 0.5) * (1.0 / W))                             # exact for ints
    colx = colf - coly * W

    # ---- hat-form scatter build + per-head matmul, NV-chunked so S stays vreg-resident ----
    head_outs = []
    for h in range(nH):
        acc = jnp.zeros((TQ, hd), jnp.float32)
        for c0 in range(0, NV, C):
            c1 = min(c0 + C, NV)
            cx = colx[:, c0:c1]                                            # (1, Cc)
            cy = coly[:, c0:c1]
            S = jnp.zeros((TQ, c1 - c0), jnp.float32)                      # <= 16 vregs
            for p in range(P):
                hp = h * P + p
                # separable bilinear hat: all 4 corners + zeros padding in one expression
                hx = jnp.maximum(1.0 - jnp.abs(cx - X[:, hp:hp + 1]), 0.0)  # (TQ, Cc)
                hy = jnp.maximum(1.0 - jnp.abs(cy - Y[:, hp:hp + 1]), 0.0)
                S = S + (aw[:, hp:hp + 1] * hx) * hy
            # MXU: (TQ, Cc) @ (Cc, hd), bf16 operands, f32 accumulation
            acc = acc + jnp.dot(S.astype(jnp.bfloat16),
                                v_ref[0, c0:c1, h * hd:(h + 1) * hd],
                                preferred_element_type=jnp.float32)
        head_outs.append(acc)

    # single full-E-width lane-dense store (no per-head masked partial stores)
    o_ref[0, :, :] = jnp.concatenate(head_outs, axis=-1).astype(o_ref.dtype)


def pallas_deform_sample(value, qa, ref_pix, H, W, num_heads, P, D,
                         tile_q=128, nv_chunk=128):
    """value: (B, NV, E) bf16; qa: (B, NQ, Npad) f32; ref_pix: (B, NQ, 2*D) f32
       -> (B, NQ, E) f32."""
    B, NV, E = value.shape
    NQ, Nqa = qa.shape[1], qa.shape[2]
    NR = ref_pix.shape[2]

    TQ = min(tile_q, ((NQ + 7) // 8) * 8)
    NQp = ((NQ + TQ - 1) // TQ) * TQ
    if NQp != NQ:
        pad = ((0, 0), (0, NQp - NQ), (0, 0))
        qa = jnp.pad(qa, pad)
        ref_pix = jnp.pad(ref_pix, pad)

    kernel = functools.partial(_deform_sample_kernel, H=H, W=W,
                               nH=num_heads, P=P, D=D, C=nv_chunk)
    out = pl.pallas_call(
        kernel,
        out_shape=jax.ShapeDtypeStruct((B, NQp, E), jnp.float32),
        grid=(B, NQp // TQ),
        in_specs=[
            # value index_map ignores the q axis -> stays VMEM-resident across query tiles
            pl.BlockSpec((1, NV, E), lambda b, q: (b, 0, 0)),
            pl.BlockSpec((1, TQ, Nqa), lambda b, q: (b, q, 0)),
            pl.BlockSpec((1, TQ, NR), lambda b, q: (b, q, 0)),
        ],
        out_specs=pl.BlockSpec((1, TQ, E), lambda b, q: (b, q, 0)),
        compiler_params=pltpu.CompilerParams(
            dimension_semantics=("parallel", "parallel"),
            vmem_limit_bytes=16 * 1024 * 1024),
    )(value, qa, ref_pix)
    return out if NQp == NQ else out[:, :NQ]


# ----------------------------------------------------------------------------
# MSDeformableAttention3D forward (num_levels == 1)
# ----------------------------------------------------------------------------
def ms_deformable_attention_3d(p, query, value, reference_points, spatial_shapes,
                               num_heads, num_points):
    B, NQ, E = query.shape
    _, NV, _ = value.shape
    num_levels = 1
    H, W = spatial_shapes[0]
    assert H * W == NV
    D = reference_points.shape[2]          # num_Z_anchors
    assert num_points % D == 0
    P = num_levels * num_points            # samples per head
    nHP = num_heads * P

    # value projection (Pallas matmul) written directly as bf16, (B, NV, E) lane-dense
    v = pallas_linear(value.reshape(B * NV, E), p["value_proj_w"], p["value_proj_b"],
                      out_dtype=jnp.bfloat16).reshape(B, NV, E)

    # fuse sampling_offsets + attention_weights into ONE matmul whose output columns are
    # permuted to [x-offsets | y-offsets | attn logits], zero-padded to a multiple of 128
    # lanes (the kernel ignores the pad -> no masked stores, no post-slice).
    so_w = p["sampling_offsets_w"].reshape(E, nHP, 2)
    so_b = p["sampling_offsets_b"].reshape(nHP, 2)
    fused_w = jnp.concatenate([so_w[:, :, 0], so_w[:, :, 1], p["attention_weights_w"]], axis=1)
    fused_b = jnp.concatenate([so_b[:, 0], so_b[:, 1], p["attention_weights_b"]], axis=0)
    n_fused = 3 * nHP
    n_pad = ((n_fused + 127) // 128) * 128
    if n_pad != n_fused:
        fused_w = jnp.pad(fused_w, ((0, 0), (0, n_pad - n_fused)))
        fused_b = jnp.pad(fused_b, ((0, n_pad - n_fused),))

    qa = pallas_linear(query.reshape(B * NQ, E), fused_w, fused_b).reshape(B, NQ, n_pad)

    # pixel-space reference points (align_corners=False: x_pix = x_norm*W - 0.5); the raw
    # offsets are already pixel-scaled (the 1/W,1/H normalisation and the *W,*H
    # un-normalisation of grid_sample cancel), so the kernel just does ref_pix + offset.
    ref_x = reference_points[..., 0] * W - 0.5                             # (B, NQ, D) (small)
    ref_y = reference_points[..., 1] * H - 0.5
    ref_pix = jnp.concatenate([ref_x, ref_y], axis=-1)                     # (B, NQ, 2*D)

    # (B, NQ, E) with channels head-major (h*hd + d) — same layout as the PyTorch output
    return pallas_deform_sample(v, qa, ref_pix, H, W, num_heads, P, D)


# ----------------------------------------------------------------------------
# SpatialCrossAttention forward
# ----------------------------------------------------------------------------
def spatial_cross_attention(params, query, key, value, reference_points_cam, bev_mask,
                            spatial_shapes, query_pos=None, num_heads=4, num_points=4):
    # query: (bs, NQ, E); key/value: (num_cams, L, bs, E)
    # reference_points_cam: (num_cams, bs, NQ, D, 2); bev_mask: (num_cams, bs, NQ, D) bool
    if key is None:
        key = query
    if value is None:
        value = key
    inp_residual = query
    if query_pos is not None:
        query = query + query_pos

    bs, NQ, E = query.shape
    num_cams, L, _, _ = key.shape

    # reshape like the PyTorch code (bs*num_cams, ...)
    value_r = jnp.transpose(value, (2, 0, 1, 3)).reshape(bs * num_cams, L, E)
    q_r = jnp.broadcast_to(query[:, None], (bs, num_cams, NQ, E)).reshape(bs * num_cams, NQ, E)
    ref_r = jnp.transpose(reference_points_cam, (1, 0, 2, 3, 4)).reshape(bs * num_cams, NQ, -1, 2)

    # TODO(synk): PyTorch rebatches only bev_mask-selected queries (data-dependent max_len);
    # here we compute all queries and mask the scatter-back, which is numerically identical.
    out = ms_deformable_attention_3d(params["deform"], q_r, value_r, ref_r, spatial_shapes,
                                     num_heads, num_points)
    out = out.reshape(bs, num_cams, NQ, E)

    # scatter-back: PyTorch derives indexes from mask_per_img[0] (batch 0) for all batches
    mask0 = (bev_mask[:, 0].sum(-1) > 0).astype(out.dtype)               # (num_cams, NQ)
    slots = jnp.sum(out * mask0[None, :, :, None], axis=1)               # (bs, NQ, E)

    count = (bev_mask.sum(-1) > 0).astype(jnp.float32)                   # (num_cams, bs, NQ)
    count = jnp.transpose(count, (1, 2, 0)).sum(-1)                      # (bs, NQ)
    count = jnp.maximum(count, 1.0)
    slots = slots / count[..., None]

    slots = pallas_linear(slots.reshape(bs * NQ, E),
                          params["output_proj_w"], params["output_proj_b"]).reshape(bs, NQ, E)
    # dropout in eval mode == identity
    return slots + inp_residual


# ----------------------------------------------------------------------------
# deterministic parameter init (mirrors the module __init__ / init_weights)
# ----------------------------------------------------------------------------
def init_params(rng, E, num_heads, num_levels, num_points):
    k1, k2 = jax.random.split(rng)

    def xavier_uniform(k, fan_in, fan_out):
        bound = math.sqrt(6.0 / (fan_in + fan_out))
        return jax.random.uniform(k, (fan_in, fan_out), jnp.float32, -bound, bound)

    # sampling_offsets bias: the rotating grid init
    thetas = jnp.arange(num_heads, dtype=jnp.float32) * (2.0 * math.pi / num_heads)
    grid = jnp.stack([jnp.cos(thetas), jnp.sin(thetas)], -1)              # (nH, 2)
    grid = grid / jnp.max(jnp.abs(grid), axis=-1, keepdims=True)
    grid = jnp.tile(grid.reshape(num_heads, 1, 1, 2), (1, num_levels, num_points, 1))
    grid = grid * jnp.arange(1, num_points + 1, dtype=jnp.float32)[None, None, :, None]
    so_bias = grid.reshape(-1)

    return {
        "deform": {
            "value_proj_w": xavier_uniform(k1, E, E),
            "value_proj_b": jnp.zeros((E,), jnp.float32),
            "sampling_offsets_w": jnp.zeros((E, num_heads * num_levels * num_points * 2), jnp.float32),
            "sampling_offsets_b": so_bias,
            "attention_weights_w": jnp.zeros((E, num_heads * num_levels * num_points), jnp.float32),
            "attention_weights_b": jnp.zeros((num_heads * num_levels * num_points,), jnp.float32),
        },
        "output_proj_w": xavier_uniform(k2, E, E),
        "output_proj_b": jnp.zeros((E,), jnp.float32),
    }


if __name__ == "__main__":
    rng = jax.random.PRNGKey(0)

    # small shapes consistent with the module
    E = 32            # embed_dims
    num_heads = 4
    num_levels = 1
    num_points = 4
    num_cams = 3
    bs = 2
    NQ = 16           # bev_h * bev_w = 4 * 4
    H_img, W_img = 8, 8
    L = H_img * W_img
    D = 4             # num_Z_anchors (divides num_points)

    params = init_params(rng, E, num_heads, num_levels, num_points)

    ks = jax.random.split(rng, 6)
    query = jax.random.normal(ks[0], (bs, NQ, E), jnp.float32)
    query_pos = 0.1 * jax.random.normal(ks[1], (bs, NQ, E), jnp.float32)
    feats = jax.random.normal(ks[2], (num_cams, L, bs, E), jnp.float32)
    reference_points_cam = jax.random.uniform(ks[3], (num_cams, bs, NQ, D, 2),
                                              jnp.float32, minval=-0.1, maxval=1.1)
    bev_mask = jax.random.uniform(ks[4], (num_cams, bs, NQ, D)) > 0.4

    spatial_shapes = ((H_img, W_img),)

    out = spatial_cross_attention(params, query, feats, feats, reference_points_cam,
                                  bev_mask, spatial_shapes, query_pos=query_pos,
                                  num_heads=num_heads, num_points=num_points)
    out = jax.block_until_ready(out)

    assert out.shape == (bs, NQ, E), out.shape
    assert bool(jnp.all(jnp.isfinite(out)))
    print("KERNEL_OK")
</pallas_src>

<mosaic_0001>
module attributes {stable_mosaic.version = 11 : i64} {
  func.func @_linear_kernel(%arg0: i32, %arg1: memref<384x32xf32, #tpu.memory_space<vmem>>, %arg2: memref<32x32xf32, #tpu.memory_space<vmem>>, %arg3: memref<1x32xf32, #tpu.memory_space<vmem>>, %arg4: memref<384x32xbf16, #tpu.memory_space<vmem>>) attributes {dimension_semantics = [#tpu.dimension_semantics<parallel>], iteration_bounds = array<i64: 1>, scalar_prefetch = 0 : i64, scratch_operands = 0 : i64, tpu.core_type = #tpu.core_type<tc>, window_params = [{transform_indices = @transform_0, window_bounds = array<i64: 384, 32>}, {pipeline_mode = #tpu.pipeline_mode<synchronous>, transform_indices = @transform_1, window_bounds = array<i64: 32, 32>}, {pipeline_mode = #tpu.pipeline_mode<synchronous>, transform_indices = @transform_2, window_bounds = array<i64: 1, 32>}, {transform_indices = @transform_3, window_bounds = array<i64: 384, 32>}]} {
    %c0 = arith.constant 0 : index
    %c0_0 = arith.constant 0 : index
    %0 = vector.load %arg1[%c0, %c0_0] : memref<384x32xf32, #tpu.memory_space<vmem>>, vector<384x32xf32>
    %c0_1 = arith.constant 0 : index
    %c0_2 = arith.constant 0 : index
    %1 = vector.load %arg2[%c0_1, %c0_2] : memref<32x32xf32, #tpu.memory_space<vmem>>, vector<32x32xf32>
    %cst = arith.constant dense<0.000000e+00> : vector<384x32xf32>
    %2 = tpu.matmul %0, %1, %cst {dimension_numbers = #tpu.dot_dimension_numbers<[1], [0], [0], [1], [0, 0, 1, 1], [], []>} : vector<384x32xf32>, vector<32x32xf32>, vector<384x32xf32> -> vector<384x32xf32>
    %c0_3 = arith.constant 0 : index
    %c0_4 = arith.constant 0 : index
    %3 = vector.load %arg3[%c0_3, %c0_4] : memref<1x32xf32, #tpu.memory_space<vmem>>, vector<1x32xf32>
    %4 = vector.broadcast %3 : vector<1x32xf32> to vector<384x32xf32>
    %5 = arith.addf %2, %4 : vector<384x32xf32>
    %6 = arith.truncf %5 : vector<384x32xf32> to vector<384x32xbf16>
    %c0_5 = arith.constant 0 : index
    %c0_6 = arith.constant 0 : index
    %7 = vector.load %arg4[%c0_5, %c0_6] : memref<384x32xbf16, #tpu.memory_space<vmem>>, vector<384x32xbf16>
    tpu.vector_store %arg4[%c0_5, %c0_6], %6 {strides = array<i32>} : memref<384x32xbf16, #tpu.memory_space<vmem>>, vector<384x32xbf16>,
    return
  }
  func.func @transform_0(%arg0: i32) -> (i32, i32) {
    %c0_i32 = arith.constant 0 : i32
    %c0_i32_0 = arith.constant 0 : i32
    return %arg0, %c0_i32 : i32, i32
  }
  func.func @transform_1(%arg0: i32) -> (i32, i32) {
    %c0_i32 = arith.constant 0 : i32
    %c0_i32_0 = arith.constant 0 : i32
    %c0_i32_1 = arith.constant 0 : i32
    return %c0_i32, %c0_i32_0 : i32, i32
  }
  func.func @transform_2(%arg0: i32) -> (i32, i32) {
    %c0_i32 = arith.constant 0 : i32
    %c0_i32_0 = arith.constant 0 : i32
    %c0_i32_1 = arith.constant 0 : i32
    return %c0_i32, %c0_i32_0 : i32, i32
  }
  func.func @transform_3(%arg0: i32) -> (i32, i32) {
    %c0_i32 = arith.constant 0 : i32
    %c0_i32_0 = arith.constant 0 : i32
    return %arg0, %c0_i32 : i32, i32
  }
}

</mosaic_0001>

<bundles_post_ra>
// kernel: tpu_custom_call.1
= control target key start
LH: loop header
LB: loop body
LE: loop exit
PB: predicated region body
PF: predicated region fallthrough
CT: control target
= control target key end

     0   :  { %vm73_vm0 = vcmask 261120   ;;  %vm715_vm1 = vcmask 257024   ;;  %s1526_s1 = inlined_call_operand.vmem [shape: f32[32,32], index: 1, kind: input, shape index: {}]   ;;  %s1527_s0 = inlined_call_operand.vmem [shape: f32[384,32], index: 0, kind: input, shape index: {}]   ;;  %s1528_s2 = inlined_call_operand.vmem [shape: f32[1,32], index: 2, kind: input, shape index: {}]   ;;  %s1529_s3 = inlined_call_operand.vmem [shape: bf16[384,32], index: 3, kind: output, shape index: {}]  }
   0x1   :  { %v62_v0 = vld [vmem:[%s1526_s1] sm:$0xff]  ;;  %v63_v1 = vld [vmem:[%s1526_s1 + $0x8] sm:$0xff]  ;;  %v64_v2 = vld [vmem:[%s1526_s1 + $0x10] sm:$0xff] }
   0x2   :  { %v1045_v3 = vpack.c.bf16 %v63_v1, %v62_v0  ;;  %v65_v4 = vld [vmem:[%s1526_s1 + $0x18] sm:$0xff]  ;;  %v14_v5 = vld [vmem:[%s1527_s0] sm:$0xff]  ;;  %v15_v8 = vld [vmem:[%s1527_s0 + $0x8] sm:$0xff] }
   0x3   :  { %v38_v6 = vld [vmem:[%s1527_s0 + $0xc0] sm:$0xff]  ;;  %v1049_v7 = vpack.c.bf16 %v65_v4, %v64_v2  ;;  %973 = vmatprep.mubr.msk.f32.mxu0 %vm73_vm0, %v14_v5  ;;  %v39_v9 = vld [vmem:[%s1527_s0 + $0xc8] sm:$0xff]  ;;  %v16_v10 = vld [vmem:[%s1527_s0 + $0x10] sm:$0xff] }
   0x4   :  { %1009 = vmatprep.mubr.msk.f32.mxu1 %vm73_vm0, %v38_v6  ;;  %1046 = vmatprep.subr.bf16.mxu0 %v1045_v3  ;;  %v40_v11 = vld [vmem:[%s1527_s0 + $0xd0] sm:$0xff]  ;;  %v17_v12 = vld [vmem:[%s1527_s0 + $0x18] sm:$0xff]  ;;  %v18_v14 = vld [vmem:[%s1527_s0 + $0x20] sm:$0xff] }
   0x5   :  { %1053 = vmatprep.subr.bf16.mxu1 %v1045_v3  ;;  %1048 = vmatpush3.bf16.msra.mxu0 %v1045_v3  ;;  %v41_v13 = vld [vmem:[%s1527_s0 + $0xd8] sm:$0xff]  ;;  %v42_v15 = vld [vmem:[%s1527_s0 + $0xe0] sm:$0xff]  ;;  %v19_v16 = vld [vmem:[%s1527_s0 + $0x28] sm:$0xff] }
   0x6   :  { %1055 = vmatpush3.bf16.msra.mxu1 %v1045_v3  ;;  %1050 = vmatprep.subr.bf16.mxu0 %v1049_v7  ;;  %v43_v17 = vld [vmem:[%s1527_s0 + $0xe8] sm:$0xff]  ;;  %v20_v18 = vld [vmem:[%s1527_s0 + $0x30] sm:$0xff]  ;;  %v21_v20 = vld [vmem:[%s1527_s0 + $0x38] sm:$0xff] }
   0x7   :  { %1054 = vmatprep.subr.bf16.mxu1 %v1049_v7  ;;  %v44_v19 = vld [vmem:[%s1527_s0 + $0xf0] sm:$0xff]  ;;  %v45_v21 = vld [vmem:[%s1527_s0 + $0xf8] sm:$0xff]  ;;  %v22_v22 = vld [vmem:[%s1527_s0 + $0x40] sm:$0xff] }
   0x8   :  { %v46_v23 = vld [vmem:[%s1527_s0 + $0x100] sm:$0xff]  ;;  %v23_v24 = vld [vmem:[%s1527_s0 + $0x48] sm:$0xff]  ;;  %v24_v26 = vld [vmem:[%s1527_s0 + $0x50] sm:$0xff] }
   0x9   :  { %1052 = vmatpush3.bf16.msra.mxu0 %v1049_v7  ;;  %v47_v25 = vld [vmem:[%s1527_s0 + $0x108] sm:$0xff]  ;;  %v48_v27 = vld [vmem:[%s1527_s0 + $0x110] sm:$0xff]  ;;  %v25_v28 = vld [vmem:[%s1527_s0 + $0x58] sm:$0xff] }
   0xa   :  { %1056 = vmatpush3.bf16.msra.mxu1 %v1049_v7  ;;  %v49_v29 = vld [vmem:[%s1527_s0 + $0x118] sm:$0xff]  ;;  %v26_v30 = vld [vmem:[%s1527_s0 + $0x60] sm:$0xff]  ;;  %v27_v32 = vld [vmem:[%s1527_s0 + $0x68] sm:$0xff] }
   0xb   :  { %v50_v31 = vld [vmem:[%s1527_s0 + $0x120] sm:$0xff]  ;;  %v51_v33 = vld [vmem:[%s1527_s0 + $0x128] sm:$0xff]  ;;  %v28_v34 = vld [vmem:[%s1527_s0 + $0x70] sm:$0xff] }
   0xc   :  { %974 = vmatmul.mubr.msk.f32.vlgmr.msra.gmra.mrb[0].mxu0 %vm73_vm0, %v15_v8  ;;  %v52_v35 = vld [vmem:[%s1527_s0 + $0x130] sm:$0xff]  ;;  %v29_v36 = vld [vmem:[%s1527_s0 + $0x78] sm:$0xff]  ;;  %v30_v38 = vld [vmem:[%s1527_s0 + $0x80] sm:$0xff] }
   0xd   :  { %1010 = vmatmul.mubr.msk.f32.vlgmr.msra.gmra.mrb[0].mxu1 %vm73_vm0, %v39_v9  ;;  %976 = vmatprep.mubr.msk.f32.mxu0 %vm73_vm0, %v16_v10  ;;  %v53_v37 = vld [vmem:[%s1527_s0 + $0x138] sm:$0xff]  ;;  %v54_v39 = vld [vmem:[%s1527_s0 + $0x140] sm:$0xff]  ;;  %v31_v40 = vld [vmem:[%s1527_s0 + $0x88] sm:$0xff] }
   0xe   :  { %1012 = vmatprep.mubr.msk.f32.mxu1 %vm73_vm0, %v40_v11  ;;  %v55_v41 = vld [vmem:[%s1527_s0 + $0x148] sm:$0xff]  ;;  %v32_v42 = vld [vmem:[%s1527_s0 + $0x90] sm:$0xff]  ;;  %v33_v44 = vld [vmem:[%s1527_s0 + $0x98] sm:$0xff] }
   0xf   :  { %v56_v43 = vld [vmem:[%s1527_s0 + $0x150] sm:$0xff]  ;;  %v57_v45 = vld [vmem:[%s1527_s0 + $0x158] sm:$0xff]  ;;  %v34_v46 = vld [vmem:[%s1527_s0 + $0xa0] sm:$0xff] }
  0x10   :  { %977 = vmatmul.mubr.msk.f32.gmra.mrb[2].mxu0 %vm73_vm0, %v17_v12  ;;  %v58_v47 = vld [vmem:[%s1527_s0 + $0x160] sm:$0xff]  ;;  %v35_v48 = vld [vmem:[%s1527_s0 + $0xa8] sm:$0xff]  ;;  %v36_v50 = vld [vmem:[%s1527_s0 + $0xb0] sm:$0xff] }
  0x11   :  { %1013 = vmatmul.mubr.msk.f32.gmra.mrb[2].mxu1 %vm73_vm0, %v41_v13  ;;  %979 = vmatprep.mubr.msk.f32.mxu0 %vm73_vm0, %v18_v14  ;;  %v59_v49 = vld [vmem:[%s1527_s0 + $0x168] sm:$0xff]  ;;  %v60_v51 = vld [vmem:[%s1527_s0 + $0x170] sm:$0xff]  ;;  %v37_v52 = vld [vmem:[%s1527_s0 + $0xb8] sm:$0xff] }
  0x12   :  { %1015 = vmatprep.mubr.msk.f32.mxu1 %vm73_vm0, %v42_v15  ;;  %v61_v53 = vld [vmem:[%s1527_s0 + $0x178] sm:$0xff]  ;;  %v1284_v54 = vld [vmem:[%s1528_s2] ss:$0 sm:$0xff] }
  0x14   :  { %980 = vmatmul.mubr.msk.f32.gmra.mrb[4].mxu0 %vm73_vm0, %v19_v16 }
  0x15   :  { %1016 = vmatmul.mubr.msk.f32.gmra.mrb[4].mxu1 %vm73_vm0, %v43_v17  ;;  %982 = vmatprep.mubr.msk.f32.mxu0 %vm73_vm0, %v20_v18 }
  0x16   :  { %1018 = vmatprep.mubr.msk.f32.mxu1 %vm73_vm0, %v44_v19 }
  0x18   :  { %983 = vmatmul.mubr.msk.f32.gmra.mrb[6].mxu0 %vm73_vm0, %v21_v20 }
  0x19   :  { %1019 = vmatmul.mubr.msk.f32.gmra.mrb[6].mxu1 %vm73_vm0, %v45_v21  ;;  %985 = vmatprep.mubr.msk.f32.mxu0 %vm73_vm0, %v22_v22 }
  0x1a   :  { %1021 = vmatprep.mubr.msk.f32.mxu1 %vm73_vm0, %v46_v23 }
  0x1c   :  { %986 = vmatmul.mubr.msk.f32.gmra.mrb[8].mxu0 %vm73_vm0, %v23_v24 }
  0x1d   :  { %1022 = vmatmul.mubr.msk.f32.gmra.mrb[8].mxu1 %vm73_vm0, %v47_v25  ;;  %988 = vmatprep.mubr.msk.f32.mxu0 %vm73_vm0, %v24_v26 }
  0x1e   :  { %1024 = vmatprep.mubr.msk.f32.mxu1 %vm73_vm0, %v48_v27 }
  0x20   :  { %989 = vmatmul.mubr.msk.f32.gmra.mrb[10].mxu0 %vm73_vm0, %v25_v28 }
  0x21   :  { %1025 = vmatmul.mubr.msk.f32.gmra.mrb[10].mxu1 %vm73_vm0, %v49_v29  ;;  %991 = vmatprep.mubr.msk.f32.mxu0 %vm73_vm0, %v26_v30 }
  0x22   :  { %1027 = vmatprep.mubr.msk.f32.mxu1 %vm73_vm0, %v50_v31 }
  0x24   :  { %992 = vmatmul.mubr.msk.f32.gmra.mrb[12].mxu0 %vm73_vm0, %v27_v32 }
  0x25   :  { %1028 = vmatmul.mubr.msk.f32.gmra.mrb[12].mxu1 %vm73_vm0, %v51_v33  ;;  %994 = vmatprep.mubr.msk.f32.mxu0 %vm73_vm0, %v28_v34 }
  0x26   :  { %1030 = vmatprep.mubr.msk.f32.mxu1 %vm73_vm0, %v52_v35 }
  0x28   :  { %995 = vmatmul.mubr.msk.f32.gmra.mrb[14].mxu0 %vm73_vm0, %v29_v36 }
  0x29   :  { %1031 = vmatmul.mubr.msk.f32.gmra.mrb[14].mxu1 %vm73_vm0, %v53_v37  ;;  %997 = vmatprep.mubr.msk.f32.mxu0 %vm73_vm0, %v30_v38 }
  0x2a   :  { %1033 = vmatprep.mubr.msk.f32.mxu1 %vm73_vm0, %v54_v39 }
  0x2c   :  { %998 = vmatmul.mubr.msk.f32.gmra.mrb[16].mxu0 %vm73_vm0, %v31_v40 }
  0x2d   :  { %1034 = vmatmul.mubr.msk.f32.gmra.mrb[16].mxu1 %vm73_vm0, %v55_v41  ;;  %1000 = vmatprep.mubr.msk.f32.mxu0 %vm73_vm0, %v32_v42 }
  0x2e   :  { %1036 = vmatprep.mubr.msk.f32.mxu1 %vm73_vm0, %v56_v43 }
  0x30   :  { %1001 = vmatmul.mubr.msk.f32.gmra.mrb[18].mxu0 %vm73_vm0, %v33_v44 }
  0x31   :  { %1037 = vmatmul.mubr.msk.f32.gmra.mrb[18].mxu1 %vm73_vm0, %v57_v45  ;;  %1003 = vmatprep.mubr.msk.f32.mxu0 %vm73_vm0, %v34_v46 }
  0x32   :  { %1039 = vmatprep.mubr.msk.f32.mxu1 %vm73_vm0, %v58_v47 }
  0x34   :  { %1004 = vmatmul.mubr.msk.f32.gmra.mrb[20].mxu0 %vm73_vm0, %v35_v48 }
  0x35   :  { %1040 = vmatmul.mubr.msk.f32.gmra.mrb[20].mxu1 %vm73_vm0, %v59_v49  ;;  %1006 = vmatprep.mubr.msk.f32.mxu0 %vm73_vm0, %v36_v50 }
  0x36   :  { %1042 = vmatprep.mubr.msk.f32.mxu1 %vm73_vm0, %v60_v51 }
  0x38   :  { %1007 = vmatmul.mubr.msk.f32.gmra.mrb[22].mxu0 %vm73_vm0, %v37_v52 }
  0x39   :  { %1043 = vmatmul.mubr.msk.f32.gmra.mrb[22].mxu1 %vm73_vm0, %v61_v53 }
  0xdf   :  { %v975_v55 = vpop.f32.mrb[0].mxu0 }
  0xe0   :  { %v1011_v56 = vpop.f32.mrb[0].mxu1  ;;  %v290_v57 = vadd.f32 %v975_v55, %v1284_v54  ;;  %v284_v59 = vpop.f32.mrb[1].mxu0 }
  0xe1   :  { %v410_v58 = vadd.f32 %v1011_v56, %v1284_v54  ;;  %v404_v60 = vpop.f32.mrb[1].mxu1  ;;  %v285_v61 = vadd.f32 %v1284_v54, %v284_v59 }
  0xe2   :  { %v405_v62 = vadd.f32 %v1284_v54, %v404_v60  ;;  %v866_v63 = vpack.c.bf16 %v290_v57, %v290_v57 }
  0xe3   :  { %v890_v0 = vpack.c.bf16 %v410_v58, %v410_v58  ;;  %v865_v1 = vpack.c.bf16 %v285_v61, %v285_v61  ;;  %v978_v3 = vpop.f32.mrb[2].mxu0 }
  0xe4   :  { %v889_v2 = vpack.c.bf16 %v405_v62, %v405_v62  ;;  %v1014_v4 = vpop.f32.mrb[2].mxu1  ;;  %717 = vst.msk [vmem:[%s1529_s3 + $0x4] sm:$0xf] %vm715_vm1, %v866_v63  ;;  %v300_v5 = vadd.f32 %v978_v3, %v1284_v54  ;;  %v294_v7 = vpop.f32.mrb[3].mxu0 }
  0xe5   :  { %741 = vst.msk [vmem:[%s1529_s3 + $0x64] sm:$0xf] %vm715_vm1, %v890_v0  ;;  %v420_v6 = vadd.f32 %v1014_v4, %v1284_v54  ;;  %v414_v8 = vpop.f32.mrb[3].mxu1  ;;  %716 = vst.msk [vmem:[%s1529_s3] sm:$0xf] %vm715_vm1, %v865_v1  ;;  %v295_v9 = vadd.f32 %v1284_v54, %v294_v7 }
  0xe6   :  { %740 = vst.msk [vmem:[%s1529_s3 + $0x60] sm:$0xf] %vm715_vm1, %v889_v2  ;;  %v415_v10 = vadd.f32 %v1284_v54, %v414_v8  ;;  %v868_v11 = vpack.c.bf16 %v300_v5, %v300_v5 }
  0xe7   :  { %v892_v12 = vpack.c.bf16 %v420_v6, %v420_v6  ;;  %v867_v13 = vpack.c.bf16 %v295_v9, %v295_v9  ;;  %v981_v15 = vpop.f32.mrb[4].mxu0 }
  0xe8   :  { %v891_v14 = vpack.c.bf16 %v415_v10, %v415_v10  ;;  %v1017_v16 = vpop.f32.mrb[4].mxu1  ;;  %719 = vst.msk [vmem:[%s1529_s3 + $0xc] sm:$0xf] %vm715_vm1, %v868_v11  ;;  %v310_v17 = vadd.f32 %v981_v15, %v1284_v54  ;;  %v304_v19 = vpop.f32.mrb[5].mxu0 }
  0xe9   :  { %743 = vst.msk [vmem:[%s1529_s3 + $0x6c] sm:$0xf] %vm715_vm1, %v892_v12  ;;  %v430_v18 = vadd.f32 %v1017_v16, %v1284_v54  ;;  %v424_v20 = vpop.f32.mrb[5].mxu1  ;;  %718 = vst.msk [vmem:[%s1529_s3 + $0x8] sm:$0xf] %vm715_vm1, %v867_v13  ;;  %v305_v21 = vadd.f32 %v1284_v54, %v304_v19 }
  0xea   :  { %742 = vst.msk [vmem:[%s1529_s3 + $0x68] sm:$0xf] %vm715_vm1, %v891_v14  ;;  %v425_v22 = vadd.f32 %v1284_v54, %v424_v20  ;;  %v870_v23 = vpack.c.bf16 %v310_v17, %v310_v17 }
  0xeb   :  { %v894_v24 = vpack.c.bf16 %v430_v18, %v430_v18  ;;  %v869_v25 = vpack.c.bf16 %v305_v21, %v305_v21  ;;  %v984_v27 = vpop.f32.mrb[6].mxu0 }
  0xec   :  { %v893_v26 = vpack.c.bf16 %v425_v22, %v425_v22  ;;  %v1020_v28 = vpop.f32.mrb[6].mxu1  ;;  %721 = vst.msk [vmem:[%s1529_s3 + $0x14] sm:$0xf] %vm715_vm1, %v870_v23  ;;  %v320_v29 = vadd.f32 %v984_v27, %v1284_v54  ;;  %v314_v31 = vpop.f32.mrb[7].mxu0 }
  0xed   :  { %745 = vst.msk [vmem:[%s1529_s3 + $0x74] sm:$0xf] %vm715_vm1, %v894_v24  ;;  %v440_v30 = vadd.f32 %v1020_v28, %v1284_v54  ;;  %v434_v32 = vpop.f32.mrb[7].mxu1  ;;  %720 = vst.msk [vmem:[%s1529_s3 + $0x10] sm:$0xf] %vm715_vm1, %v869_v25  ;;  %v315_v33 = vadd.f32 %v1284_v54, %v314_v31 }
  0xee   :  { %744 = vst.msk [vmem:[%s1529_s3 + $0x70] sm:$0xf] %vm715_vm1, %v893_v26  ;;  %v435_v34 = vadd.f32 %v1284_v54, %v434_v32  ;;  %v872_v35 = vpack.c.bf16 %v320_v29, %v320_v29 }
  0xef   :  { %v896_v36 = vpack.c.bf16 %v440_v30, %v440_v30  ;;  %v871_v37 = vpack.c.bf16 %v315_v33, %v315_v33  ;;  %v987_v39 = vpop.f32.mrb[8].mxu0 }
  0xf0   :  { %v895_v38 = vpack.c.bf16 %v435_v34, %v435_v34  ;;  %v1023_v40 = vpop.f32.mrb[8].mxu1  ;;  %723 = vst.msk [vmem:[%s1529_s3 + $0x1c] sm:$0xf] %vm715_vm1, %v872_v35  ;;  %v330_v41 = vadd.f32 %v987_v39, %v1284_v54  ;;  %v324_v43 = vpop.f32.mrb[9].mxu0 }
  0xf1   :  { %747 = vst.msk [vmem:[%s1529_s3 + $0x7c] sm:$0xf] %vm715_vm1, %v896_v36  ;;  %v450_v42 = vadd.f32 %v1023_v40, %v1284_v54  ;;  %v444_v44 = vpop.f32.mrb[9].mxu1  ;;  %722 = vst.msk [vmem:[%s1529_s3 + $0x18] sm:$0xf] %vm715_vm1, %v871_v37  ;;  %v325_v45 = vadd.f32 %v1284_v54, %v324_v43 }
  0xf2   :  { %746 = vst.msk [vmem:[%s1529_s3 + $0x78] sm:$0xf] %vm715_vm1, %v895_v38  ;;  %v445_v46 = vadd.f32 %v1284_v54, %v444_v44  ;;  %v874_v47 = vpack.c.bf16 %v330_v41, %v330_v41 }
  0xf3   :  { %v898_v48 = vpack.c.bf16 %v450_v42, %v450_v42  ;;  %v873_v49 = vpack.c.bf16 %v325_v45, %v325_v45  ;;  %v990_v51 = vpop.f32.mrb[10].mxu0 }
  0xf4   :  { %v897_v50 = vpack.c.bf16 %v445_v46, %v445_v46  ;;  %v1026_v52 = vpop.f32.mrb[10].mxu1  ;;  %725 = vst.msk [vmem:[%s1529_s3 + $0x24] sm:$0xf] %vm715_vm1, %v874_v47  ;;  %v340_v53 = vadd.f32 %v990_v51, %v1284_v54  ;;  %v334_v56 = vpop.f32.mrb[11].mxu0 }
  0xf5   :  { %749 = vst.msk [vmem:[%s1529_s3 + $0x84] sm:$0xf] %vm715_vm1, %v898_v48  ;;  %v460_v55 = vadd.f32 %v1026_v52, %v1284_v54  ;;  %v454_v57 = vpop.f32.mrb[11].mxu1  ;;  %724 = vst.msk [vmem:[%s1529_s3 + $0x20] sm:$0xf] %vm715_vm1, %v873_v49  ;;  %v335_v58 = vadd.f32 %v1284_v54, %v334_v56 }
  0xf6   :  { %748 = vst.msk [vmem:[%s1529_s3 + $0x80] sm:$0xf] %vm715_vm1, %v897_v50  ;;  %v455_v59 = vadd.f32 %v1284_v54, %v454_v57  ;;  %v876_v60 = vpack.c.bf16 %v340_v53, %v340_v53 }
  0xf7   :  { %v900_v61 = vpack.c.bf16 %v460_v55, %v460_v55  ;;  %v875_v62 = vpack.c.bf16 %v335_v58, %v335_v58  ;;  %v993_v0 = vpop.f32.mrb[12].mxu0 }
  0xf8   :  { %v899_v63 = vpack.c.bf16 %v455_v59, %v455_v59  ;;  %v1029_v1 = vpop.f32.mrb[12].mxu1  ;;  %727 = vst.msk [vmem:[%s1529_s3 + $0x2c] sm:$0xf] %vm715_vm1, %v876_v60  ;;  %v350_v2 = vadd.f32 %v993_v0, %v1284_v54  ;;  %v344_v4 = vpop.f32.mrb[13].mxu0 }
  0xf9   :  { %751 = vst.msk [vmem:[%s1529_s3 + $0x8c] sm:$0xf] %vm715_vm1, %v900_v61  ;;  %v470_v3 = vadd.f32 %v1029_v1, %v1284_v54  ;;  %v464_v5 = vpop.f32.mrb[13].mxu1  ;;  %726 = vst.msk [vmem:[%s1529_s3 + $0x28] sm:$0xf] %vm715_vm1, %v875_v62  ;;  %v345_v6 = vadd.f32 %v1284_v54, %v344_v4 }
  0xfa   :  { %750 = vst.msk [vmem:[%s1529_s3 + $0x88] sm:$0xf] %vm715_vm1, %v899_v63  ;;  %v465_v7 = vadd.f32 %v1284_v54, %v464_v5  ;;  %v878_v8 = vpack.c.bf16 %v350_v2, %v350_v2 }
  0xfb   :  { %v902_v9 = vpack.c.bf16 %v470_v3, %v470_v3  ;;  %v877_v10 = vpack.c.bf16 %v345_v6, %v345_v6  ;;  %v996_v12 = vpop.f32.mrb[14].mxu0 }
  0xfc   :  { %v901_v11 = vpack.c.bf16 %v465_v7, %v465_v7  ;;  %v1032_v13 = vpop.f32.mrb[14].mxu1  ;;  %729 = vst.msk [vmem:[%s1529_s3 + $0x34] sm:$0xf] %vm715_vm1, %v878_v8  ;;  %v360_v14 = vadd.f32 %v996_v12, %v1284_v54  ;;  %v354_v16 = vpop.f32.mrb[15].mxu0 }
  0xfd   :  { %753 = vst.msk [vmem:[%s1529_s3 + $0x94] sm:$0xf] %vm715_vm1, %v902_v9  ;;  %v480_v15 = vadd.f32 %v1032_v13, %v1284_v54  ;;  %v474_v17 = vpop.f32.mrb[15].mxu1  ;;  %728 = vst.msk [vmem:[%s1529_s3 + $0x30] sm:$0xf] %vm715_vm1, %v877_v10  ;;  %v355_v18 = vadd.f32 %v1284_v54, %v354_v16 }
  0xfe   :  { %752 = vst.msk [vmem:[%s1529_s3 + $0x90] sm:$0xf] %vm715_vm1, %v901_v11  ;;  %v475_v19 = vadd.f32 %v1284_v54, %v474_v17  ;;  %v880_v20 = vpack.c.bf16 %v360_v14, %v360_v14 }
  0xff   :  { %v904_v21 = vpack.c.bf16 %v480_v15, %v480_v15  ;;  %v879_v22 = vpack.c.bf16 %v355_v18, %v355_v18  ;;  %v999_v24 = vpop.f32.mrb[16].mxu0 }
 0x100   :  { %v903_v23 = vpack.c.bf16 %v475_v19, %v475_v19  ;;  %v1035_v25 = vpop.f32.mrb[16].mxu1  ;;  %731 = vst.msk [vmem:[%s1529_s3 + $0x3c] sm:$0xf] %vm715_vm1, %v880_v20  ;;  %v370_v26 = vadd.f32 %v999_v24, %v1284_v54  ;;  %v364_v28 = vpop.f32.mrb[17].mxu0 }
 0x101   :  { %755 = vst.msk [vmem:[%s1529_s3 + $0x9c] sm:$0xf] %vm715_vm1, %v904_v21  ;;  %v490_v27 = vadd.f32 %v1035_v25, %v1284_v54  ;;  %v484_v29 = vpop.f32.mrb[17].mxu1  ;;  %730 = vst.msk [vmem:[%s1529_s3 + $0x38] sm:$0xf] %vm715_vm1, %v879_v22  ;;  %v365_v30 = vadd.f32 %v1284_v54, %v364_v28 }
 0x102   :  { %754 = vst.msk [vmem:[%s1529_s3 + $0x98] sm:$0xf] %vm715_vm1, %v903_v23  ;;  %v485_v31 = vadd.f32 %v1284_v54, %v484_v29  ;;  %v882_v32 = vpack.c.bf16 %v370_v26, %v370_v26 }
 0x103   :  { %v906_v33 = vpack.c.bf16 %v490_v27, %v490_v27  ;;  %v881_v34 = vpack.c.bf16 %v365_v30, %v365_v30  ;;  %v1002_v36 = vpop.f32.mrb[18].mxu0 }
 0x104   :  { %v905_v35 = vpack.c.bf16 %v485_v31, %v485_v31  ;;  %v1038_v37 = vpop.f32.mrb[18].mxu1  ;;  %733 = vst.msk [vmem:[%s1529_s3 + $0x44] sm:$0xf] %vm715_vm1, %v882_v32  ;;  %v380_v38 = vadd.f32 %v1002_v36, %v1284_v54  ;;  %v374_v40 = vpop.f32.mrb[19].mxu0 }
 0x105   :  { %757 = vst.msk [vmem:[%s1529_s3 + $0xa4] sm:$0xf] %vm715_vm1, %v906_v33  ;;  %v500_v39 = vadd.f32 %v1038_v37, %v1284_v54  ;;  %v494_v41 = vpop.f32.mrb[19].mxu1  ;;  %732 = vst.msk [vmem:[%s1529_s3 + $0x40] sm:$0xf] %vm715_vm1, %v881_v34  ;;  %v375_v42 = vadd.f32 %v1284_v54, %v374_v40 }
 0x106   :  { %756 = vst.msk [vmem:[%s1529_s3 + $0xa0] sm:$0xf] %vm715_vm1, %v905_v35  ;;  %v495_v43 = vadd.f32 %v1284_v54, %v494_v41  ;;  %v884_v44 = vpack.c.bf16 %v380_v38, %v380_v38 }
 0x107   :  { %v908_v45 = vpack.c.bf16 %v500_v39, %v500_v39  ;;  %v883_v46 = vpack.c.bf16 %v375_v42, %v375_v42  ;;  %v1005_v48 = vpop.f32.mrb[20].mxu0 }
 0x108   :  { %v907_v47 = vpack.c.bf16 %v495_v43, %v495_v43  ;;  %v1041_v49 = vpop.f32.mrb[20].mxu1  ;;  %735 = vst.msk [vmem:[%s1529_s3 + $0x4c] sm:$0xf] %vm715_vm1, %v884_v44  ;;  %v390_v50 = vadd.f32 %v1005_v48, %v1284_v54  ;;  %v384_v52 = vpop.f32.mrb[21].mxu0 }
 0x109   :  { %759 = vst.msk [vmem:[%s1529_s3 + $0xac] sm:$0xf] %vm715_vm1, %v908_v45  ;;  %v510_v51 = vadd.f32 %v1041_v49, %v1284_v54  ;;  %v504_v53 = vpop.f32.mrb[21].mxu1  ;;  %734 = vst.msk [vmem:[%s1529_s3 + $0x48] sm:$0xf] %vm715_vm1, %v883_v46  ;;  %v385_v55 = vadd.f32 %v1284_v54, %v384_v52 }
 0x10a   :  { %758 = vst.msk [vmem:[%s1529_s3 + $0xa8] sm:$0xf] %vm715_vm1, %v907_v47  ;;  %v505_v56 = vadd.f32 %v1284_v54, %v504_v53  ;;  %v886_v57 = vpack.c.bf16 %v390_v50, %v390_v50 }
 0x10b   :  { %v910_v58 = vpack.c.bf16 %v510_v51, %v510_v51  ;;  %v885_v59 = vpack.c.bf16 %v385_v55, %v385_v55  ;;  %v1008_v61 = vpop.f32.mrb[22].mxu0 }
 0x10c   :  { %v909_v60 = vpack.c.bf16 %v505_v56, %v505_v56  ;;  %v1044_v62 = vpop.f32.mrb[22].mxu1  ;;  %737 = vst.msk [vmem:[%s1529_s3 + $0x54] sm:$0xf] %vm715_vm1, %v886_v57  ;;  %v400_v63 = vadd.f32 %v1008_v61, %v1284_v54  ;;  %v394_v1 = vpop.f32.mrb[23].mxu0 }
 0x10d   :  { %761 = vst.msk [vmem:[%s1529_s3 + $0xb4] sm:$0xf] %vm715_vm1, %v910_v58  ;;  %v520_v0 = vadd.f32 %v1044_v62, %v1284_v54  ;;  %v514_v2 = vpop.f32.mrb[23].mxu1  ;;  %736 = vst.msk [vmem:[%s1529_s3 + $0x50] sm:$0xf] %vm715_vm1, %v885_v59  ;;  %v395_v3 = vadd.f32 %v1284_v54, %v394_v1 }
 0x10e   :  { %760 = vst.msk [vmem:[%s1529_s3 + $0xb0] sm:$0xf] %vm715_vm1, %v909_v60  ;;  %v515_v4 = vadd.f32 %v1284_v54, %v514_v2  ;;  %v888_v5 = vpack.c.bf16 %v400_v63, %v400_v63 }
 0x10f   :  { %v912_v6 = vpack.c.bf16 %v520_v0, %v520_v0  ;;  %v887_v7 = vpack.c.bf16 %v395_v3, %v395_v3 }
 0x110   :  { %v911_v8 = vpack.c.bf16 %v515_v4, %v515_v4  ;;  %739 = vst.msk [vmem:[%s1529_s3 + $0x5c] sm:$0xf] %vm715_vm1, %v888_v5 }
 0x111   :  { %763 = vst.msk [vmem:[%s1529_s3 + $0xbc] sm:$0xf] %vm715_vm1, %v912_v6  ;;  %738 = vst.msk [vmem:[%s1529_s3 + $0x58] sm:$0xf] %vm715_vm1, %v887_v7 }
 0x112   :  { %762 = vst.msk [vmem:[%s1529_s3 + $0xb8] sm:$0xf] %vm715_vm1, %v911_v8 }

</bundles_post_ra>
